<compile_context>
chip_gen: v7x
topology: tpu7x:2x2x1
jax: 0.10.0
libtpu: 0.0.40
codegen_flags: <defaults>
</compile_context>

<pallas_src>
import jax
import jax.numpy as jnp
from jax.experimental import pallas as pl
from jax.experimental.pallas import tpu as pltpu

# cleanrl SAC convention
LOG_STD_MAX = 2.0
LOG_STD_MIN = -5.0

H1, H2, H3, H4 = 256, 128, 64, 32


def _round_up(n, m):
    return ((n + m - 1) // m) * m


def _choose_batch_tile(B):
    """Batch tile: big tiles (<=1024 rows) but >=2 grid steps for B > 16 so the
    parallel axis can shard across both v7x TensorCores."""
    if B <= 16:
        return _round_up(B, 8)
    return min(1024, _round_up((B + 1) // 2, 8))


def make_actor_kernel(act_dim, compute_dtype):
    """Kernel closure over the (static) action dimension and matmul dtype."""

    def actor_kernel(x_ref,
                     w1_ref, b1_ref,
                     w2_ref, b2_ref,
                     w3_ref, b3_ref,
                     w4_ref, b4_ref,
                     wh_ref, bh_ref,
                     out_ref):
        # Cast the streamed x tile to the weight dtype (bf16) inside the kernel
        # (free VPU cast; avoids an extra XLA cast pass over x in HBM).
        x = x_ref[...].astype(compute_dtype)

        # fc1..fc4 with ReLU: bf16 MXU matmuls, f32 accumulation, f32 bias add.
        h = jnp.dot(x, w1_ref[...], preferred_element_type=jnp.float32) + b1_ref[...]
        h = jnp.maximum(h, 0.0).astype(compute_dtype)
        h = jnp.dot(h, w2_ref[...], preferred_element_type=jnp.float32) + b2_ref[...]
        h = jnp.maximum(h, 0.0).astype(compute_dtype)
        h = jnp.dot(h, w3_ref[...], preferred_element_type=jnp.float32) + b3_ref[...]
        h = jnp.maximum(h, 0.0).astype(compute_dtype)
        h = jnp.dot(h, w4_ref[...], preferred_element_type=jnp.float32) + b4_ref[...]
        h = jnp.maximum(h, 0.0).astype(compute_dtype)

        # dropout(p=0.1): identity in eval mode (contract: this kernel is eval-only).
        # TODO(synk): training-mode dropout (pltpu.prng_random_bits mask + 1/(1-p) scale)

        # Fused heads: one GEMM producing the lane-dense 128-wide slab
        # [mean | log_std_raw | zero-pad].
        head = jnp.dot(h, wh_ref[...], preferred_element_type=jnp.float32) + bh_ref[...]

        # tanh + affine on the full slab (EUP tanh + VPU affine are free slots
        # relative to the MXU chain); lane mask selects raw mean vs squashed
        # log_std. The tanh of the mean lanes is computed then discarded.
        ls = jnp.tanh(head)
        ls = LOG_STD_MIN + 0.5 * (LOG_STD_MAX - LOG_STD_MIN) * (ls + 1.0)

        lane = jax.lax.broadcasted_iota(jnp.int32, head.shape, dimension=1)
        out_ref[...] = jnp.where(lane < act_dim, head, ls)

    return actor_kernel


def _resident_spec(shape):
    """Full-array block that stays at block (0, 0) for every grid step."""
    assert len(shape) == 2
    return pl.BlockSpec(shape, lambda i: (0, 0))


def prepare_actor_weights(params, weights_dtype=jnp.bfloat16):
    """One-time weight prep, hoisted out of the per-call path.

    Fuses fc_mean / fc_logstd into one lane-dense (H4, 128) slab (zero-padded
    columns), and casts matmul weights to `weights_dtype` (bf16 by default).
    Biases stay f32.
    """
    act_dim = params["wm"].shape[1]
    head_pad = max(128, _round_up(2 * act_dim, 128))

    wh = jnp.concatenate([params["wm"], params["wl"]], axis=1)   # (H4, 2*act_dim)
    bh = jnp.concatenate([params["bm"], params["bl"]], axis=1)   # (1,  2*act_dim)
    wh = jnp.pad(wh, ((0, 0), (0, head_pad - 2 * act_dim)))
    bh = jnp.pad(bh, ((0, 0), (0, head_pad - 2 * act_dim)))

    weight_args = (
        params["w1"].astype(weights_dtype), params["b1"].astype(jnp.float32),
        params["w2"].astype(weights_dtype), params["b2"].astype(jnp.float32),
        params["w3"].astype(weights_dtype), params["b3"].astype(jnp.float32),
        params["w4"].astype(weights_dtype), params["b4"].astype(jnp.float32),
        wh.astype(weights_dtype), bh.astype(jnp.float32),
    )
    return weight_args, act_dim, head_pad


def actor_forward(x, prepared):
    """x: (B, obs_dim) float32. prepared: output of prepare_actor_weights.

    Returns (mean, log_std), each (B, act_dim) float32.
    """
    weight_args, act_dim, head_pad = prepared
    B, obs_dim = x.shape
    compute_dtype = weight_args[0].dtype

    # Batch tiling: weights stay VMEM-resident, x / output stream over the grid.
    # No wrapper-side pad: Pallas masks the partial edge block; rows are
    # independent so garbage edge rows are harmless and never stored past B.
    TB = _choose_batch_tile(B)
    grid = (pl.cdiv(B, TB),)

    in_specs = [pl.BlockSpec((TB, obs_dim), lambda i: (i, 0))]
    in_specs += [_resident_spec(w.shape) for w in weight_args]
    out_spec = pl.BlockSpec((TB, head_pad), lambda i: (i, 0))

    flops = 2 * B * (obs_dim * H1 + H1 * H2 + H2 * H3 + H3 * H4 + H4 * head_pad)
    bytes_accessed = (x.size * x.dtype.itemsize
                      + sum(int(w.size) * w.dtype.itemsize for w in weight_args)
                      + B * head_pad * 4)
    cost = pl.CostEstimate(flops=flops,
                           transcendentals=B * head_pad,
                           bytes_accessed=bytes_accessed)

    out = pl.pallas_call(
        make_actor_kernel(act_dim, compute_dtype),
        out_shape=jax.ShapeDtypeStruct((B, head_pad), jnp.float32),
        grid=grid,
        in_specs=in_specs,
        out_specs=out_spec,
        compiler_params=pltpu.CompilerParams(
            dimension_semantics=("parallel",)),
        cost_estimate=cost,
    )(x, *weight_args)

    mean = out[:, :act_dim]
    log_std = out[:, act_dim:2 * act_dim]
    return mean, log_std


def init_params(key, obs_dim, act_dim):
    """Deterministic PyTorch-Linear-style init (uniform +-1/sqrt(fan_in))."""
    dims = [(obs_dim, H1), (H1, H2), (H2, H3), (H3, H4), (H4, act_dim), (H4, act_dim)]
    names = ["1", "2", "3", "4", "m", "l"]
    params = {}
    for (fan_in, fan_out), name in zip(dims, names):
        key, kw, kb = jax.random.split(key, 3)
        bound = 1.0 / jnp.sqrt(jnp.float32(fan_in))
        params["w" + name] = jax.random.uniform(
            kw, (fan_in, fan_out), jnp.float32, -bound, bound)
        # biases kept 2D (1, fan_out) so they are lane-major in VMEM
        params["b" + name] = jax.random.uniform(
            kb, (1, fan_out), jnp.float32, -bound, bound)
    return params


if __name__ == "__main__":
    key = jax.random.PRNGKey(0)
    batch, obs_dim, act_dim = 8, 16, 4

    k_x, k_p = jax.random.split(key)
    x = jax.random.normal(k_x, (batch, obs_dim), dtype=jnp.float32)
    params = init_params(k_p, obs_dim, act_dim)

    # One-time weight prep (fusion, 128-lane pad, bf16 cast) outside the hot path.
    prepared = prepare_actor_weights(params)

    mean, log_std = actor_forward(x, prepared)
    jax.block_until_ready((mean, log_std))

    assert mean.shape == (batch, act_dim) and log_std.shape == (batch, act_dim)

    # Pure-JAX reference using the same bf16-weight / f32-accumulate recipe
    # (dtype choice is a documented design decision; checked consistently here).
    def ref(x, p, dtype=jnp.bfloat16):
        def lin(h, w, b):
            return jnp.dot(h.astype(dtype), w.astype(dtype),
                           preferred_element_type=jnp.float32) + b
        h = jnp.maximum(lin(x, p["w1"], p["b1"]), 0.0)
        h = jnp.maximum(lin(h, p["w2"], p["b2"]), 0.0)
        h = jnp.maximum(lin(h, p["w3"], p["b3"]), 0.0)
        h = jnp.maximum(lin(h, p["w4"], p["b4"]), 0.0)
        m = lin(h, p["wm"], p["bm"])
        ls = jnp.tanh(lin(h, p["wl"], p["bl"]))
        ls = LOG_STD_MIN + 0.5 * (LOG_STD_MAX - LOG_STD_MIN) * (ls + 1.0)
        return m, ls

    m_ref, ls_ref = ref(x, params)
    assert jnp.allclose(mean, m_ref, atol=1e-2, rtol=1e-2), \
        float(jnp.max(jnp.abs(mean - m_ref)))
    assert jnp.allclose(log_std, ls_ref, atol=1e-2, rtol=1e-2), \
        float(jnp.max(jnp.abs(log_std - ls_ref)))

    print("KERNEL_OK")
</pallas_src>

<mosaic_0001>
module attributes {stable_mosaic.version = 11 : i64} {
  func.func @actor_kernel(%arg0: i32, %arg1: memref<8x16xf32, #tpu.memory_space<vmem>>, %arg2: memref<16x256xbf16, #tpu.memory_space<vmem>>, %arg3: memref<1x256xf32, #tpu.memory_space<vmem>>, %arg4: memref<256x128xbf16, #tpu.memory_space<vmem>>, %arg5: memref<1x128xf32, #tpu.memory_space<vmem>>, %arg6: memref<128x64xbf16, #tpu.memory_space<vmem>>, %arg7: memref<1x64xf32, #tpu.memory_space<vmem>>, %arg8: memref<64x32xbf16, #tpu.memory_space<vmem>>, %arg9: memref<1x32xf32, #tpu.memory_space<vmem>>, %arg10: memref<32x128xbf16, #tpu.memory_space<vmem>>, %arg11: memref<1x128xf32, #tpu.memory_space<vmem>>, %arg12: memref<8x128xf32, #tpu.memory_space<vmem>>) attributes {dimension_semantics = [#tpu.dimension_semantics<parallel>], iteration_bounds = array<i64: 1>, scalar_prefetch = 0 : i64, scratch_operands = 0 : i64, tpu.core_type = #tpu.core_type<tc>, window_params = [{transform_indices = @transform_0, window_bounds = array<i64: 8, 16>}, {pipeline_mode = #tpu.pipeline_mode<synchronous>, transform_indices = @transform_1, window_bounds = array<i64: 16, 256>}, {pipeline_mode = #tpu.pipeline_mode<synchronous>, transform_indices = @transform_2, window_bounds = array<i64: 1, 256>}, {pipeline_mode = #tpu.pipeline_mode<synchronous>, transform_indices = @transform_3, window_bounds = array<i64: 256, 128>}, {pipeline_mode = #tpu.pipeline_mode<synchronous>, transform_indices = @transform_4, window_bounds = array<i64: 1, 128>}, {pipeline_mode = #tpu.pipeline_mode<synchronous>, transform_indices = @transform_5, window_bounds = array<i64: 128, 64>}, {pipeline_mode = #tpu.pipeline_mode<synchronous>, transform_indices = @transform_6, window_bounds = array<i64: 1, 64>}, {pipeline_mode = #tpu.pipeline_mode<synchronous>, transform_indices = @transform_7, window_bounds = array<i64: 64, 32>}, {pipeline_mode = #tpu.pipeline_mode<synchronous>, transform_indices = @transform_8, window_bounds = array<i64: 1, 32>}, {pipeline_mode = #tpu.pipeline_mode<synchronous>, transform_indices = @transform_9, window_bounds = array<i64: 32, 128>}, {pipeline_mode = #tpu.pipeline_mode<synchronous>, transform_indices = @transform_10, window_bounds = array<i64: 1, 128>}, {transform_indices = @transform_11, window_bounds = array<i64: 8, 128>}]} {
    %c0 = arith.constant 0 : index
    %c0_0 = arith.constant 0 : index
    %0 = vector.load %arg1[%c0, %c0_0] : memref<8x16xf32, #tpu.memory_space<vmem>>, vector<8x16xf32>
    %1 = arith.truncf %0 : vector<8x16xf32> to vector<8x16xbf16>
    %c0_1 = arith.constant 0 : index
    %c0_2 = arith.constant 0 : index
    %2 = vector.load %arg2[%c0_1, %c0_2] : memref<16x256xbf16, #tpu.memory_space<vmem>>, vector<16x256xbf16>
    %cst = arith.constant dense<0.000000e+00> : vector<8x256xf32>
    %3 = tpu.matmul %1, %2, %cst {dimension_numbers = #tpu.dot_dimension_numbers<[1], [0], [0], [1], [0, 0, 1, 1], [], []>} : vector<8x16xbf16>, vector<16x256xbf16>, vector<8x256xf32> -> vector<8x256xf32>
    %c0_3 = arith.constant 0 : index
    %c0_4 = arith.constant 0 : index
    %4 = vector.load %arg3[%c0_3, %c0_4] : memref<1x256xf32, #tpu.memory_space<vmem>>, vector<1x256xf32>
    %5 = vector.broadcast %4 : vector<1x256xf32> to vector<8x256xf32>
    %6 = arith.addf %3, %5 : vector<8x256xf32>
    %cst_5 = arith.constant 0.000000e+00 : f32
    %7 = vector.broadcast %cst_5 : f32 to vector<8x256xf32>
    %8 = arith.maximumf %6, %7 : vector<8x256xf32>
    %9 = arith.truncf %8 : vector<8x256xf32> to vector<8x256xbf16>
    %c0_6 = arith.constant 0 : index
    %c0_7 = arith.constant 0 : index
    %10 = vector.load %arg4[%c0_6, %c0_7] : memref<256x128xbf16, #tpu.memory_space<vmem>>, vector<256x128xbf16>
    %cst_8 = arith.constant dense<0.000000e+00> : vector<8x128xf32>
    %11 = tpu.matmul %9, %10, %cst_8 {dimension_numbers = #tpu.dot_dimension_numbers<[1], [0], [0], [1], [0, 0, 1, 1], [], []>} : vector<8x256xbf16>, vector<256x128xbf16>, vector<8x128xf32> -> vector<8x128xf32>
    %c0_9 = arith.constant 0 : index
    %c0_10 = arith.constant 0 : index
    %12 = vector.load %arg5[%c0_9, %c0_10] : memref<1x128xf32, #tpu.memory_space<vmem>>, vector<1x128xf32>
    %13 = vector.broadcast %12 : vector<1x128xf32> to vector<8x128xf32>
    %14 = arith.addf %11, %13 : vector<8x128xf32>
    %cst_11 = arith.constant 0.000000e+00 : f32
    %15 = vector.broadcast %cst_11 : f32 to vector<8x128xf32>
    %16 = arith.maximumf %14, %15 : vector<8x128xf32>
    %17 = arith.truncf %16 : vector<8x128xf32> to vector<8x128xbf16>
    %c0_12 = arith.constant 0 : index
    %c0_13 = arith.constant 0 : index
    %18 = vector.load %arg6[%c0_12, %c0_13] : memref<128x64xbf16, #tpu.memory_space<vmem>>, vector<128x64xbf16>
    %cst_14 = arith.constant dense<0.000000e+00> : vector<8x64xf32>
    %19 = tpu.matmul %17, %18, %cst_14 {dimension_numbers = #tpu.dot_dimension_numbers<[1], [0], [0], [1], [0, 0, 1, 1], [], []>} : vector<8x128xbf16>, vector<128x64xbf16>, vector<8x64xf32> -> vector<8x64xf32>
    %c0_15 = arith.constant 0 : index
    %c0_16 = arith.constant 0 : index
    %20 = vector.load %arg7[%c0_15, %c0_16] : memref<1x64xf32, #tpu.memory_space<vmem>>, vector<1x64xf32>
    %21 = vector.broadcast %20 : vector<1x64xf32> to vector<8x64xf32>
    %22 = arith.addf %19, %21 : vector<8x64xf32>
    %cst_17 = arith.constant 0.000000e+00 : f32
    %23 = vector.broadcast %cst_17 : f32 to vector<8x64xf32>
    %24 = arith.maximumf %22, %23 : vector<8x64xf32>
    %25 = arith.truncf %24 : vector<8x64xf32> to vector<8x64xbf16>
    %c0_18 = arith.constant 0 : index
    %c0_19 = arith.constant 0 : index
    %26 = vector.load %arg8[%c0_18, %c0_19] : memref<64x32xbf16, #tpu.memory_space<vmem>>, vector<64x32xbf16>
    %cst_20 = arith.constant dense<0.000000e+00> : vector<8x32xf32>
    %27 = tpu.matmul %25, %26, %cst_20 {dimension_numbers = #tpu.dot_dimension_numbers<[1], [0], [0], [1], [0, 0, 1, 1], [], []>} : vector<8x64xbf16>, vector<64x32xbf16>, vector<8x32xf32> -> vector<8x32xf32>
    %c0_21 = arith.constant 0 : index
    %c0_22 = arith.constant 0 : index
    %28 = vector.load %arg9[%c0_21, %c0_22] : memref<1x32xf32, #tpu.memory_space<vmem>>, vector<1x32xf32>
    %29 = vector.broadcast %28 : vector<1x32xf32> to vector<8x32xf32>
    %30 = arith.addf %27, %29 : vector<8x32xf32>
    %cst_23 = arith.constant 0.000000e+00 : f32
    %31 = vector.broadcast %cst_23 : f32 to vector<8x32xf32>
    %32 = arith.maximumf %30, %31 : vector<8x32xf32>
    %33 = arith.truncf %32 : vector<8x32xf32> to vector<8x32xbf16>
    %c0_24 = arith.constant 0 : index
    %c0_25 = arith.constant 0 : index
    %34 = vector.load %arg10[%c0_24, %c0_25] : memref<32x128xbf16, #tpu.memory_space<vmem>>, vector<32x128xbf16>
    %cst_26 = arith.constant dense<0.000000e+00> : vector<8x128xf32>
    %35 = tpu.matmul %33, %34, %cst_26 {dimension_numbers = #tpu.dot_dimension_numbers<[1], [0], [0], [1], [0, 0, 1, 1], [], []>} : vector<8x32xbf16>, vector<32x128xbf16>, vector<8x128xf32> -> vector<8x128xf32>
    %c0_27 = arith.constant 0 : index
    %c0_28 = arith.constant 0 : index
    %36 = vector.load %arg11[%c0_27, %c0_28] : memref<1x128xf32, #tpu.memory_space<vmem>>, vector<1x128xf32>
    %37 = vector.broadcast %36 : vector<1x128xf32> to vector<8x128xf32>
    %38 = arith.addf %35, %37 : vector<8x128xf32>
    %39 = math.tanh %38 : vector<8x128xf32>
    %cst_29 = arith.constant 1.000000e+00 : f32
    %40 = vector.broadcast %cst_29 : f32 to vector<8x128xf32>
    %41 = arith.addf %39, %40 : vector<8x128xf32>
    %cst_30 = arith.constant 3.500000e+00 : f32
    %42 = vector.broadcast %cst_30 : f32 to vector<8x128xf32>
    %43 = arith.mulf %42, %41 : vector<8x128xf32>
    %cst_31 = arith.constant -5.000000e+00 : f32
    %44 = vector.broadcast %cst_31 : f32 to vector<8x128xf32>
    %45 = arith.addf %44, %43 : vector<8x128xf32>
    %46 = tpu.iota {dimensions = array<i32: 1>} : vector<8x128xi32>
    %c4_i32 = arith.constant 4 : i32
    %47 = vector.broadcast %c4_i32 : i32 to vector<8x128xi32>
    %48 = arith.cmpi slt, %46, %47 : vector<8x128xi32>
    %49 = arith.select %48, %38, %45 : vector<8x128xi1>, vector<8x128xf32>
    %c0_32 = arith.constant 0 : index
    %c0_33 = arith.constant 0 : index
    %50 = vector.load %arg12[%c0_32, %c0_33] : memref<8x128xf32, #tpu.memory_space<vmem>>, vector<8x128xf32>
    tpu.vector_store %arg12[%c0_32, %c0_33], %49 {strides = array<i32>} : memref<8x128xf32, #tpu.memory_space<vmem>>, vector<8x128xf32>,
    return
  }
  func.func @transform_0(%arg0: i32) -> (i32, i32) {
    %c0_i32 = arith.constant 0 : i32
    %c0_i32_0 = arith.constant 0 : i32
    return %arg0, %c0_i32 : i32, i32
  }
  func.func @transform_1(%arg0: i32) -> (i32, i32) {
    %c0_i32 = arith.constant 0 : i32
    %c0_i32_0 = arith.constant 0 : i32
    %c0_i32_1 = arith.constant 0 : i32
    return %c0_i32, %c0_i32_0 : i32, i32
  }
  func.func @transform_2(%arg0: i32) -> (i32, i32) {
    %c0_i32 = arith.constant 0 : i32
    %c0_i32_0 = arith.constant 0 : i32
    %c0_i32_1 = arith.constant 0 : i32
    return %c0_i32, %c0_i32_0 : i32, i32
  }
  func.func @transform_3(%arg0: i32) -> (i32, i32) {
    %c0_i32 = arith.constant 0 : i32
    %c0_i32_0 = arith.constant 0 : i32
    %c0_i32_1 = arith.constant 0 : i32
    return %c0_i32, %c0_i32_0 : i32, i32
  }
  func.func @transform_4(%arg0: i32) -> (i32, i32) {
    %c0_i32 = arith.constant 0 : i32
    %c0_i32_0 = arith.constant 0 : i32
    %c0_i32_1 = arith.constant 0 : i32
    return %c0_i32, %c0_i32_0 : i32, i32
  }
  func.func @transform_5(%arg0: i32) -> (i32, i32) {
    %c0_i32 = arith.constant 0 : i32
    %c0_i32_0 = arith.constant 0 : i32
    %c0_i32_1 = arith.constant 0 : i32
    return %c0_i32, %c0_i32_0 : i32, i32
  }
  func.func @transform_6(%arg0: i32) -> (i32, i32) {
    %c0_i32 = arith.constant 0 : i32
    %c0_i32_0 = arith.constant 0 : i32
    %c0_i32_1 = arith.constant 0 : i32
    return %c0_i32, %c0_i32_0 : i32, i32
  }
  func.func @transform_7(%arg0: i32) -> (i32, i32) {
    %c0_i32 = arith.constant 0 : i32
    %c0_i32_0 = arith.constant 0 : i32
    %c0_i32_1 = arith.constant 0 : i32
    return %c0_i32, %c0_i32_0 : i32, i32
  }
  func.func @transform_8(%arg0: i32) -> (i32, i32) {
    %c0_i32 = arith.constant 0 : i32
    %c0_i32_0 = arith.constant 0 : i32
    %c0_i32_1 = arith.constant 0 : i32
    return %c0_i32, %c0_i32_0 : i32, i32
  }
  func.func @transform_9(%arg0: i32) -> (i32, i32) {
    %c0_i32 = arith.constant 0 : i32
    %c0_i32_0 = arith.constant 0 : i32
    %c0_i32_1 = arith.constant 0 : i32
    return %c0_i32, %c0_i32_0 : i32, i32
  }
  func.func @transform_10(%arg0: i32) -> (i32, i32) {
    %c0_i32 = arith.constant 0 : i32
    %c0_i32_0 = arith.constant 0 : i32
    %c0_i32_1 = arith.constant 0 : i32
    return %c0_i32, %c0_i32_0 : i32, i32
  }
  func.func @transform_11(%arg0: i32) -> (i32, i32) {
    %c0_i32 = arith.constant 0 : i32
    %c0_i32_0 = arith.constant 0 : i32
    return %arg0, %c0_i32 : i32, i32
  }
}

</mosaic_0001>

<bundles_post_ra>
// kernel: tpu_custom_call.1
= control target key start
LH: loop header
LB: loop body
LE: loop exit
PB: predicated region body
PF: predicated region fallthrough
CT: control target
= control target key end

     0   :  { %16 = vsyncpa [#allocation3], 0  ;;  %s1208_s0 = inlined_call_operand.hbm [shape: f32[8,16], index: 0, kind: input, shape index: {}]   ;;  %s1209_s1 = inlined_call_operand.hbm [shape: bf16[16,256], index: 1, kind: input, shape index: {}]   ;;  %s1210_s2 = inlined_call_operand.vmem [shape: f32[1,256], index: 2, kind: input, shape index: {}]   ;;  %s1211_s3 = inlined_call_operand.vmem [shape: bf16[256,128], index: 3, kind: input, shape index: {}]   ;;  %s1212_s4 = inlined_call_operand.hbm [shape: f32[1,128], index: 4, kind: input, shape index: {}]   ;;  %s1213_s5 = inlined_call_operand.vmem [shape: bf16[128,64], index: 5, kind: input, shape index: {}]   ;;  %s1214_s6 = inlined_call_operand.hbm [shape: f32[1,64], index: 6, kind: input, shape index: {}]   ;;  %s1215_s7 = inlined_call_operand.vmem [shape: bf16[64,32], index: 7, kind: input, shape index: {}]   ;;  %s1216_s8 = inlined_call_operand.hbm [shape: f32[1,32], index: 8, kind: input, shape index: {}]   ;;  %s1217_s9 = inlined_call_operand.vmem [shape: bf16[32,128], index: 9, kind: input, shape index: {}]   ;;  %s1218_s10 = inlined_call_operand.vmem [shape: f32[1,128], index: 10, kind: input, shape index: {}]   ;;  %s1219_s11 = inlined_call_operand.hbm [shape: f32[8,128], index: 11, kind: output, shape index: {}]  }
   0x1   :  { %17 = vsyncpa [#allocation6], 0 }
   0x2   :  { %18 = vsyncpa [#allocation9], 0 }
   0x3   :  { %19 = vsyncpa [#allocation4], 0  ;;  %s947_s17 = smov [#allocation5]   ;;  %s807_s21 = scalar_lea.hbm %s1209_s1, 256 }
   0x4   :  { %s35_s18 = sshll.u32 %s947_s17, 4  ;;  %p808_p0 = scmp.ne.s32.totalorder %s1209_s1, %s807_s21  ;;  %s36_s18 = int_to_ptr.vmem [resolvable:$true] %s35_s18 }
   0x5   :  { %p811_p1 = scmp.lt.u32.totalorder %s807_s21, %s1209_s1 }
   0x7   :  { %p813_p2 = pnand %p811_p1, %p808_p0 }
   0x9   :  { %816 = shalt.err (!%p813_p2)
}
   0xa   :  { %s817_s26 = scalar_lea.vmem %s36_s18, 256  ;;  %p822_p4 = scmp.lt.s32.totalorder %s36_s18, %s36_s18 }
   0xb   :  { %p818_p3 = scmp.ne.s32.totalorder %s36_s18, %s817_s26  ;;  %p823_p5 = scmp.lt.s32.totalorder %s817_s26, %s817_s26 }
   0xd   :  { %p824_p6 = por %p823_p5, %p822_p4 }
   0xf   :  { %p825_p7 = pnand %p824_p6, %p818_p3 }
  0x11   :  { %828 = shalt.err (!%p825_p7)
}
  0x12   :  { %s948_s27 = smov 128   ;;  %s949_s28 = smov 8  }
  0x13   :  { %41 = dma.hbm_to_vmem [thread:$0]  %s1209_s1, 256, %s36_s18, [#allocation6], %s948_s27, %s948_s27, %s949_s28  }
  0x14   :  { %s950_s12 = smov [#allocation8]   ;;  %s951_s14 = smov [#allocation2]  }
  0x15   :  { %s64_s13 = sshll.u32 %s950_s12, 4  ;;  %s26_s15 = sshll.u32 %s951_s14, 4  ;;  %s65_s13 = int_to_ptr.vmem [resolvable:$true] %s64_s13  ;;  %s27_s15 = int_to_ptr.vmem [resolvable:$true] %s26_s15 }
  0x16   :  { %s829_s19 = scalar_lea.hbm %s1214_s6, 16 }
  0x17   :  { %p830_p8 = scmp.ne.s32.totalorder %s1214_s6, %s829_s19  ;;  %p833_p9 = scmp.lt.u32.totalorder %s829_s19, %s1214_s6 }
  0x19   :  { %p835_p10 = pnand %p833_p9, %p830_p8 }
  0x1b   :  { %838 = shalt.err (!%p835_p10)
}
  0x1c   :  { %s839_s1 = scalar_lea.vmem %s65_s13, 16  ;;  %s843_s18 = scalar_lea.vmem %s65_s13, 32 }
  0x1d   :  { %p840_p11 = scmp.ne.s32.totalorder %s65_s13, %s839_s1  ;;  %p844_p12 = scmp.lt.s32.totalorder %s65_s13, %s65_s13 }
  0x1e   :  { %p845_p13 = scmp.lt.s32.totalorder %s843_s18, %s839_s1 }
  0x20   :  { %p846_p0 = por %p845_p13, %p844_p12 }
  0x22   :  { %p847_p1 = pnand %p846_p0, %p840_p11 }
  0x24   :  { %850 = shalt.err (!%p847_p1)
}
  0x25   :  { %67 = dma.hbm_to_vmem [thread:$0]  %s1214_s6, 16, %s65_s13, [#allocation9]  }
  0x26   :  { %s851_s28 = scalar_lea.hbm %s1208_s0, 128 }
  0x27   :  { %p852_p2 = scmp.ne.s32.totalorder %s1208_s0, %s851_s28  ;;  %p855_p3 = scmp.lt.u32.totalorder %s851_s28, %s1208_s0 }
  0x29   :  { %p857_p4 = pnand %p855_p3, %p852_p2 }
  0x2b   :  { %860 = shalt.err (!%p857_p4)
}
  0x2c   :  { %s861_s16 = scalar_lea.vmem %s27_s15, 128  ;;  %p866_p6 = scmp.lt.s32.totalorder %s27_s15, %s27_s15 }
  0x2d   :  { %p862_p5 = scmp.ne.s32.totalorder %s27_s15, %s861_s16  ;;  %p867_p7 = scmp.lt.s32.totalorder %s861_s16, %s861_s16 }
  0x2f   :  { %p868_p8 = por %p867_p7, %p866_p6 }
  0x31   :  { %p869_p9 = pnand %p868_p8, %p862_p5 }
  0x33   :  { %872 = shalt.err (!%p869_p9)
}
  0x34   :  { %29 = dma.hbm_to_vmem [thread:$0]  %s1208_s0, 128, %s27_s15, [#allocation3]  }
  0x35   :  { %s952_s17 = smov [#allocation7]   ;;  %s953_s20 = smov [#allocation10]  }
  0x36   :  { %s52_s19 = sshll.u32 %s952_s17, 4  ;;  %s76_s21 = sshll.u32 %s953_s20, 4  ;;  %s53_s19 = int_to_ptr.vmem [resolvable:$true] %s52_s19  ;;  %s77_s21 = int_to_ptr.vmem [resolvable:$true] %s76_s21 }
  0x37   :  { %s873_s1 = scalar_lea.hbm %s1212_s4, 16 }
  0x38   :  { %p874_p10 = scmp.ne.s32.totalorder %s1212_s4, %s873_s1  ;;  %p877_p11 = scmp.lt.u32.totalorder %s873_s1, %s1212_s4 }
  0x3a   :  { %p879_p12 = pnand %p877_p11, %p874_p10 }
  0x3c   :  { %882 = shalt.err (!%p879_p12)
}
  0x3d   :  { %s883_s0 = scalar_lea.vmem %s53_s19, 16  ;;  %s887_s15 = scalar_lea.vmem %s53_s19, 32 }
  0x3e   :  { %p884_p13 = scmp.ne.s32.totalorder %s53_s19, %s883_s0  ;;  %p888_p0 = scmp.lt.s32.totalorder %s53_s19, %s53_s19 }
  0x3f   :  { %p889_p1 = scmp.lt.s32.totalorder %s887_s15, %s883_s0 }
  0x41   :  { %p890_p2 = por %p889_p1, %p888_p0 }
  0x43   :  { %p891_p3 = pnand %p890_p2, %p884_p13 }
  0x45   :  { %894 = shalt.err (!%p891_p3)
}
  0x46   :  { %55 = dma.hbm_to_vmem [thread:$0]  %s1212_s4, 16, %s53_s19, [#allocation6]  }
  0x47   :  { %s895_s12 = scalar_lea.hbm %s1216_s8, 16 }
  0x48   :  { %p896_p4 = scmp.ne.s32.totalorder %s1216_s8, %s895_s12  ;;  %p899_p5 = scmp.lt.u32.totalorder %s895_s12, %s1216_s8 }
  0x4a   :  { %p901_p6 = pnand %p899_p5, %p896_p4 }
  0x4c   :  { %904 = shalt.err (!%p901_p6)
}
  0x4d   :  { %s905_s17 = scalar_lea.vmem %s77_s21, 16  ;;  %s909_s20 = scalar_lea.vmem %s77_s21, 32 }
  0x4e   :  { %p906_p7 = scmp.ne.s32.totalorder %s77_s21, %s905_s17  ;;  %p910_p8 = scmp.lt.s32.totalorder %s77_s21, %s77_s21 }
  0x4f   :  { %p911_p9 = scmp.lt.s32.totalorder %s909_s20, %s905_s17 }
  0x51   :  { %p912_p10 = por %p911_p9, %p910_p8 }
  0x53   :  { %p913_p11 = pnand %p912_p10, %p906_p7 }
  0x55   :  { %916 = shalt.err (!%p913_p11)
}
  0x56   :  { %79 = dma.hbm_to_vmem [thread:$0]  %s1216_s8, 16, %s77_s21, [#allocation9]  }
  0x57   :  { %939 = dma.done.wait [#allocation3], 128  }
  0x58   :  { %940 = vsyncadd [#allocation3], 4294967168 }
  0x59   :  { %941 = dma.done.wait [#allocation6], 272  }
  0x5a   :  { %942 = vsyncadd [#allocation6], 4294967024 }
  0x5b   :  { %943 = dma.done.wait [#allocation9], 32  }
  0x5c   :  { %944 = vsyncadd [#allocation9], 4294967264  ;;  %v954_v0 = vmov 0   ;;  %v772_v1 = vld [vmem:[#allocation5 + $0x4] ss:$8 sps:$4 sm:$0xff]   ;;  %v100_v3 = vld [vmem:[#allocation2] sm:$0xff]  ;;  %v106_v28 = vlaneseq }
  0x5d   :  { %162 = vmatprep.mubr.bf16.mxu0 %v954_v0  ;;  %v774_v2 = vld [vmem:[#allocation5] ss:$8 sps:$4 sm:$0xff]   ;;  %130 = vmatprep.subr.bf16.mxu0 %v772_v1  ;;  %v101_v4 = vpack.c.bf16 %v100_v3, %v100_v3  ;;  %v775_v5 = vld [vmem:[%s1211_s3 + $0x40] sm:$0xff]   ;;  %vm126_vm0 = vcmask 130048   ;;  %v781_v11 = vld [vmem:[%s1211_s3 + $0x58] sm:$0xff]   ;;  %v955_v22 = vmov 0.0  }
  0x5e   :  { %131 = vmatpush1.bf16.msra.mxu0 %v774_v2  ;;  %v776_v6 = vld [vmem:[%s1211_s3] sm:$0xff]   ;;  %682 = vmatprep.subr.bf16.mxu1 %v775_v5  ;;  %v777_v7 = vld [vmem:[%s1211_s3 + $0x48] sm:$0xff]   ;;  %v779_v9 = vld [vmem:[%s1211_s3 + $0x50] sm:$0xff]   ;;  %v107_v29 = vshrl.u32 %v106_v28, 7  ;;  %vm956_vm1 = vmmov 0   ;;  %vm504_vm2 = vcmask 523264  }
  0x5f   :  { %683 = vmatpush3.bf16.msra.mxu1 %v776_v6  ;;  %v778_v8 = vld [vmem:[%s1211_s3 + $0x8] sm:$0xff]   ;;  %v780_v10 = vld [vmem:[%s1211_s3 + $0x10] sm:$0xff]   ;;  %v782_v12 = vld [vmem:[%s1211_s3 + $0x18] sm:$0xff]   ;;  %721 = vmatprep.subr.bf16.mxu0 %v955_v22  ;;  %vm573_vm3 = vcmask 261120  }
  0x60   :  { %684 = vmatprep.subr.bf16.mxu1 %v777_v7  ;;  %v783_v13 = vld [vmem:[%s1211_s3 + $0x60] sm:$0xff]   ;;  %v785_v15 = vld [vmem:[%s1211_s3 + $0x68] sm:$0xff]   ;;  %v787_v17 = vld [vmem:[%s1211_s3 + $0x70] sm:$0xff]   ;;  %v108_v30 = vsub.s32 0, %v107_v29  ;;  %v112_v32 = vsub.s32 1, %v107_v29 }
  0x61   :  { %645 = vmatmul.mubr.msk.bf16.vlgmr.msra.gmra.mrb[0].mxu0 %vm126_vm0, %v101_v4  ;;  %v784_v14 = vld [vmem:[%s1211_s3 + $0x20] sm:$0xff]   ;;  %v786_v16 = vld [vmem:[%s1211_s3 + $0x28] sm:$0xff]   ;;  %v788_v18 = vld [vmem:[%s1211_s3 + $0x30] sm:$0xff]  }
  0x62   :  { %v789_v19 = vld [vmem:[%s1211_s3 + $0x78] sm:$0xff]   ;;  %v791_v21 = vld [vmem:[%s1213_s5] sm:$0xff]   ;;  %v792_v23 = vld [vmem:[%s1213_s5 + $0x8] sm:$0xff]   ;;  %737 = vmatprep.mubr.msk.bf16.mxu0 %vm956_vm1, %v955_v22 }
  0x63   :  { %685 = vmatpush3.bf16.msra.mxu1 %v778_v8  ;;  %v790_v20 = vld [vmem:[%s1211_s3 + $0x38] sm:$0xff]   ;;  %722 = vmatpush3.bf16.msra.mxu0 %v791_v21  ;;  %v793_v24 = vld [vmem:[%s1213_s5 + $0x10] sm:$0xff]   ;;  %v795_v26 = vld [vmem:[%s1213_s5 + $0x20] sm:$0xff]   ;;  %v622_v21 = vand.u32 127, %v106_v28 }
  0x64   :  { %686 = vmatprep.subr.bf16.mxu1 %v779_v9  ;;  %723 = vmatprep.subr.bf16.mxu0 %v955_v22  ;;  %v794_v25 = vld [vmem:[%s1213_s5 + $0x18] sm:$0xff]   ;;  %v796_v27 = vld [vmem:[%s1213_s5 + $0x28] sm:$0xff]   ;;  %v104_v31 = vld [vmem:[%s1210_s2] sm:$0x3] }
  0x65   :  { %v109_v33 = vrot.slane %v104_v31, %v108_v30  ;;  %v113_v34 = vrot.slane %v104_v31, %v112_v32  ;;  %v797_v45 = vld [vmem:[%s1213_s5 + $0x30] sm:$0xff]   ;;  %v798_v46 = vld [vmem:[%s1213_s5 + $0x38] sm:$0xff]   ;;  %v799_v47 = vld [vmem:[%s1215_s7] sm:$0xff]   ;;  %vm623_vm4 = vcmp.lt.s32.totalorder %v622_v21, 4 }
  0x66   :  { %v800_v48 = vld [vmem:[%s1215_s7 + $0x8] sm:$0xff]   ;;  %v646_v50 = vld [vmem:[#allocation7] ss:$0 sm:$0xff]  ;;  %v801_v58 = vld [vmem:[%s1215_s7 + $0x10] sm:$0xff]  }
  0x67   :  { %687 = vmatpush3.bf16.msra.mxu1 %v780_v10  ;;  %724 = vmatpush3.bf16.msra.mxu0 %v792_v23  ;;  %v802_v59 = vld [vmem:[%s1215_s7 + $0x18] sm:$0xff]   ;;  %v803_v60 = vld [vmem:[%s1217_s9] sm:$0xff]   ;;  %v804_v5 = vld [vmem:[%s1217_s9 + $0x8] sm:$0xff]   ;;  %s957_s9 = smov [#allocation11]  }
  0x68   :  { %688 = vmatprep.subr.bf16.mxu1 %v781_v11  ;;  %725 = vmatprep.subr.bf16.mxu0 %v955_v22  ;;  %v663_v61 = vld [vmem:[#allocation8] ss:$0 sm:$0xff]  ;;  %v672_v6 = vld [vmem:[#allocation10] ss:$0 sm:$0xff]  ;;  %s632_s3 = sshll.u32 %s957_s9, 4  ;;  %s633_s3 = int_to_ptr.vmem [resolvable:$true] %s632_s3 }
  0x69   :  { %s917_s28 = scalar_lea.vmem %s633_s3, 128  ;;  %p922_p13 = scmp.lt.s32.totalorder %s633_s3, %s633_s3 }
  0x6a   :  { %p918_p12 = scmp.ne.s32.totalorder %s633_s3, %s917_s28  ;;  %p923_p0 = scmp.lt.s32.totalorder %s917_s28, %s917_s28 }
  0x6b   :  { %689 = vmatpush3.bf16.msra.mxu1 %v782_v12  ;;  %726 = vmatpush3.bf16.msra.mxu0 %v793_v24 }
  0x6c   :  { %690 = vmatprep.subr.bf16.mxu1 %v783_v13  ;;  %727 = vmatprep.subr.bf16.mxu0 %v955_v22  ;;  %p924_p1 = por %p923_p0, %p922_p13 }
  0x6e   :  { %p925_p2 = pnand %p924_p1, %p918_p12 }
  0x6f   :  { %691 = vmatpush3.bf16.msra.mxu1 %v784_v14  ;;  %728 = vmatpush3.bf16.msra.mxu0 %v794_v25  ;;  %v678_v14 = vld [vmem:[%s1218_s10] ss:$0 sm:$0xff] }
  0x70   :  { %692 = vmatprep.subr.bf16.mxu1 %v785_v15  ;;  %729 = vmatprep.subr.bf16.mxu0 %v955_v22 }
  0x73   :  { %693 = vmatpush3.bf16.msra.mxu1 %v786_v16  ;;  %730 = vmatpush3.bf16.msra.mxu0 %v795_v26 }
  0x74   :  { %694 = vmatprep.subr.bf16.mxu1 %v787_v17  ;;  %731 = vmatprep.subr.bf16.mxu0 %v955_v22 }
  0x77   :  { %695 = vmatpush3.bf16.msra.mxu1 %v788_v18  ;;  %732 = vmatpush3.bf16.msra.mxu0 %v796_v27 }
  0x78   :  { %696 = vmatprep.subr.bf16.mxu1 %v789_v19  ;;  %733 = vmatprep.subr.bf16.mxu0 %v955_v22 }
  0x7b   :  { %697 = vmatpush3.bf16.msra.mxu1 %v790_v20  ;;  %734 = vmatpush3.bf16.msra.mxu0 %v797_v45 }
  0x7c   :  { %741 = vmatprep.subr.bf16.mxu1 %v955_v22  ;;  %735 = vmatprep.subr.bf16.mxu0 %v955_v22 }
  0x7f   :  { %736 = vmatpush3.bf16.msra.mxu0 %v798_v46 }
  0x80   :  { %753 = vmatprep.subr.bf16.mxu0 %v955_v22 }
 0x134   :  { %v164_v35 = vpop.f32.mrb[0].mxu0 }
 0x135   :  { %v165_v36 = vadd.f32 %v164_v35, %v109_v33  ;;  %v166_v37 = vpop.f32.mrb[1].mxu0 }
 0x136   :  { %v167_v38 = vadd.f32 %v166_v37, %v113_v34  ;;  %v168_v39 = vpop.f32.mrb[2].mxu0 }
 0x137   :  { %v171_v40 = vmax.f32 %v165_v36, 0.0  ;;  %v169_v41 = vpop.f32.mrb[3].mxu0 }
 0x138   :  { %v172_v42 = vmax.f32 %v167_v38, 0.0 }
 0x139   :  { %v173_v44 = vpack.c.bf16 %v171_v40, %v171_v40 }
 0x13a   :  { %v174_v43 = vpack.c.bf16 %v172_v42, %v172_v42 }
 0x13c   :  { %342 = vmatprep.mubr.bf16.mxu1 %v174_v43 }
 0x13d   :  { %343 = vmatmul.mubr.bf16.vlgmr.msra.gmra.mrb[0].mxu1 %v173_v44 }
 0x13e   :  { %749 = vmatprep.mubr.msk.bf16.mxu1 %vm956_vm1, %v955_v22  ;;  %742 = vmatpush3.bf16.msra.mxu1 %v799_v47 }
 0x13f   :  { %743 = vmatprep.subr.bf16.mxu1 %v955_v22 }
 0x142   :  { %744 = vmatpush3.bf16.msra.mxu1 %v800_v48 }
 0x143   :  { %745 = vmatprep.subr.bf16.mxu1 %v955_v22 }
 0x146   :  { %746 = vmatpush3.bf16.msra.mxu1 %v801_v58 }
 0x147   :  { %747 = vmatprep.subr.bf16.mxu1 %v955_v22 }
 0x14a   :  { %748 = vmatpush3.bf16.msra.mxu1 %v802_v59 }
 0x210   :  { %v698_v49 = vpop.f32.mrb[0].mxu1 }
 0x211   :  { %v699_v51 = vpop.f32.mrb[1].mxu1 }
 0x212   :  { %v700_v52 = vadd.f32 %v699_v51, %v698_v49  ;;  %v701_v53 = vpop.f32.mrb[2].mxu1 }
 0x213   :  { %v702_v54 = vpop.f32.mrb[3].mxu1 }
 0x214   :  { %v345_v55 = vadd.f32 %v700_v52, %v646_v50 }
 0x216   :  { %v350_v56 = vmax.f32 %v345_v55, 0.0 }
 0x218   :  { %v351_v57 = vpack.c.bf16 %v350_v56, %v350_v56 }
 0x21a   :  { %738 = vmatmul.mubr.bf16.vlgmr.msra.gmra.mrb[4].mxu0 %v351_v57 }
 0x21b   :  { %757 = vmatprep.mubr.msk.bf16.mxu0 %vm956_vm1, %v955_v22  ;;  %754 = vmatpush3.bf16.msra.mxu0 %v803_v60 }
 0x21c   :  { %755 = vmatprep.subr.bf16.mxu0 %v955_v22 }
 0x21f   :  { %756 = vmatpush3.bf16.msra.mxu0 %v804_v5 }
 0x2ed   :  { %v457_v62 = vpop.f32.mrb[4].mxu0 }
 0x2ee   :  { %v458_v63 = vadd.f32 %v663_v61, %v457_v62  ;;  %v739_v0 = vpop.f32.mrb[5].mxu0 }
 0x2ef   :  { %v460_v1 = vpop.f32.mrb[6].mxu0 }
 0x2f0   :  { %v463_v2 = vmax.f32 %v458_v63, 0.0  ;;  %v740_v3 = vpop.f32.mrb[7].mxu0 }
 0x2f2   :  { %v464_v4 = vpack.c.bf16 %v463_v2, %v463_v2 }
 0x2f4   :  { %750 = vmatmul.mubr.msk.bf16.vlgmr.msra.gmra.mrb[4].mxu1 %vm504_vm2, %v464_v4 }
 0x3c7   :  { %v542_v7 = vpop.f32.mrb[4].mxu1 }
 0x3c8   :  { %v543_v8 = vadd.f32 %v672_v6, %v542_v7  ;;  %v751_v9 = vpop.f32.mrb[5].mxu1 }
 0x3c9   :  { %v545_v10 = vpop.f32.mrb[6].mxu1 }
 0x3ca   :  { %v548_v11 = vmax.f32 %v543_v8, 0.0  ;;  %v752_v12 = vpop.f32.mrb[7].mxu1 }
 0x3cc   :  { %v549_v13 = vpack.c.bf16 %v548_v11, %v548_v11 }
 0x3ce   :  { %758 = vmatmul.mubr.msk.bf16.vlgmr.msra.gmra.mrb[8].mxu0 %vm573_vm3, %v549_v13 }
 0x4a1   :  { %v611_v15 = vpop.f32.mrb[8].mxu0 }
 0x4a2   :  { %v612_v16 = vadd.f32 %v678_v14, %v611_v15  ;;  %v759_v17 = vpop.f32.mrb[9].mxu0 }
 0x4a3   :  { %v614_v18 = vpop.f32.mrb[10].mxu0 }
 0x4a4   :  { %805 = vtanh.f32 %v612_v16  ;;  %v760_v19 = vpop.f32.mrb[11].mxu0 }
 0x4ae   :  { %v806_v20 = vpop.eup %805 }
 0x4af   :  { %v618_v22 = vadd.f32 1.0, %v806_v20 }
 0x4b1   :  { %v619_v23 = vmul.f32 3.5, %v618_v22 }
 0x4b3   :  { %v620_v24 = vadd.f32 -5.0, %v619_v23 }
 0x4b5   :  { %v624_v25 = vsel %vm623_vm4, %v612_v16, %v620_v24 }
 0x4b6   :  { %625 = vst [vmem:[#allocation11] sm:$0xff] %v624_v25 }
 0x4b7   :  { %928 = shalt.err (!%p925_p2)
}
 0x4b8   :  { %s929_s30 = scalar_lea.hbm %s1219_s11, 128 }
 0x4b9   :  { %p930_p3 = scmp.ne.s32.totalorder %s1219_s11, %s929_s30  ;;  %p933_p4 = scmp.lt.u32.totalorder %s929_s30, %s1219_s11 }
 0x4bb   :  { %p935_p5 = pnand %p933_p4, %p930_p3 }
 0x4bd   :  { %938 = shalt.err (!%p935_p5)
}
 0x4be   :  { %635 = dma.vmem_to_hbm [thread:$0]  %s633_s3, 128, %s1219_s11, [#allocation4]  }
 0x4bf   :  { %945 = dma.done.wait [#allocation4], 128  }
 0x4c0   :  { %946 = vsyncadd [#allocation4], 4294967168 }
 0x4c1   :  { %639 = vsyncpa [#allocation3], 1 }
 0x4c2   :  { %640 = vsyncpa [#allocation6], 1 }
 0x4c3   :  { %641 = vsyncpa [#allocation9], 1 }
 0x4c4   :  { %642 = vsyncpa [#allocation4], 1 }

</bundles_post_ra>
